<compile_context>
chip_gen: v5e
topology: v5e:2x2
jax: 0.10.0
libtpu: 0.0.40
codegen_flags: <defaults>
</compile_context>

<pallas_src>
import functools

import jax
import jax.numpy as jnp
import numpy as np
from jax import lax
from jax.experimental import pallas as pl
from jax.experimental.pallas import tpu as pltpu


def _mha_kernel(q_ref, k_ref, v_ref,
                wq_ref, wk_ref, wv_ref,
                fcw_ref, fcb_ref, g_ref, b_ref,
                o_ref,
                *, n_head, d_k, d_v, bb, len_q, len_k, temperature, ln_eps):
    d_model = q_ref.shape[-1]

    # Collapse the batch block into the row (sublane) axis: layout-free because
    # len_q / len_k are multiples of 8.
    q2 = q_ref[...].reshape(bb * len_q, d_model)   # (BB*Lq, d_model)
    k2 = k_ref[...].reshape(bb * len_k, d_model)   # (BB*Lk, d_model)
    v2 = v_ref[...].reshape(bb * len_k, d_model)   # (BB*Lk, d_model)

    # Fused all-head projections: wide matmuls over the whole batch block.
    q_all = jnp.dot(q2, wq_ref[...], preferred_element_type=jnp.float32)  # (BB*Lq, H*d_k)
    k_all = jnp.dot(k2, wk_ref[...], preferred_element_type=jnp.float32)  # (BB*Lk, H*d_k)
    v_all = jnp.dot(v2, wv_ref[...], preferred_element_type=jnp.float32)  # (BB*Lk, H*d_v)

    inv_temp = 1.0 / temperature

    # Per-head attention, batched over the BB batches in this block.
    head_outs = []
    for h in range(n_head):
        qh = q_all[:, h * d_k:(h + 1) * d_k].reshape(bb, len_q, d_k)
        kh = k_all[:, h * d_k:(h + 1) * d_k].reshape(bb, len_k, d_k)
        vh = v_all[:, h * d_v:(h + 1) * d_v].reshape(bb, len_k, d_v)

        scores = jnp.einsum("bqd,bkd->bqk", qh, kh,
                            preferred_element_type=jnp.float32) * inv_temp
        scores = scores - jnp.max(scores, axis=-1, keepdims=True)
        e = jnp.exp(scores)
        attn = e * pl.reciprocal(jnp.sum(e, axis=-1, keepdims=True), approx=True)
        oh = jnp.einsum("bqk,bkd->bqd", attn, vh,
                        preferred_element_type=jnp.float32)
        head_outs.append(oh.reshape(bb * len_q, d_v))

    out_cat = jnp.concatenate(head_outs, axis=-1)                         # (BB*Lq, H*d_v)

    # Output projection over all heads + bias + residual + LayerNorm.
    y = jnp.dot(out_cat, fcw_ref[...], preferred_element_type=jnp.float32)  # (BB*Lq, d_model)
    y = y + fcb_ref[...] + q2
    mean = jnp.mean(y, axis=-1, keepdims=True)
    var = jnp.mean((y - mean) ** 2, axis=-1, keepdims=True)
    y = (y - mean) * lax.rsqrt(var + ln_eps)
    y = y * g_ref[...] + b_ref[...]

    o_ref[...] = y.reshape(bb, len_q, d_model).astype(o_ref.dtype)


def prepare_mha_params(params, *, n_head, d_k, d_v, d_model):
    """One-time layout conversion of PyTorch-style weights (do at load time)."""
    # nn.Linear computes x @ W^T; head h occupies rows/cols [h*d : (h+1)*d], so a
    # plain transpose gives the fused (d_model, H*d_k) / (H*d_v, d_model) layouts.
    return {
        "wq_all": jnp.asarray(params["w_qs"]).T,            # (d_model, H*d_k)
        "wk_all": jnp.asarray(params["w_ks"]).T,            # (d_model, H*d_k)
        "wv_all": jnp.asarray(params["w_vs"]).T,            # (d_model, H*d_v)
        "fcw_all": jnp.asarray(params["fc_w"]).T,           # (H*d_v, d_model)
        "fcb": jnp.asarray(params["fc_b"]).reshape(1, d_model),
        "ln_g": jnp.asarray(params["ln_g"]).reshape(1, d_model),
        "ln_b": jnp.asarray(params["ln_b"]).reshape(1, d_model),
    }


def _pick_batch_block(B, cap=8):
    """Largest divisor of B not exceeding `cap` (batches fused per grid step)."""
    for bb in range(min(B, cap), 0, -1):
        if B % bb == 0:
            return bb
    return 1


def multi_head_attention(q, k, v, prepared, *, n_head, d_k, d_v):
    """q, k, v: (B, L, d_model) float32.  Returns (B, L, d_model)."""
    B, len_q, d_model = q.shape
    _, len_k, _ = k.shape

    bb = _pick_batch_block(B)
    grid = (B // bb,)

    kernel = functools.partial(_mha_kernel,
                               n_head=n_head, d_k=d_k, d_v=d_v,
                               bb=bb, len_q=len_q, len_k=len_k,
                               temperature=float(np.power(d_k, 0.5)),
                               ln_eps=1e-5)

    grid_spec = pltpu.PrefetchScalarGridSpec(
        num_scalar_prefetch=0,
        grid=grid,
        in_specs=[
            pl.BlockSpec((bb, len_q, d_model), lambda i: (i, 0, 0)),       # q block
            pl.BlockSpec((bb, len_k, d_model), lambda i: (i, 0, 0)),       # k block
            pl.BlockSpec((bb, len_k, d_model), lambda i: (i, 0, 0)),       # v block
            # Grid-invariant weights: stay resident in VMEM across the grid.
            pl.BlockSpec((d_model, n_head * d_k), lambda i: (0, 0)),       # Wq (all heads)
            pl.BlockSpec((d_model, n_head * d_k), lambda i: (0, 0)),       # Wk
            pl.BlockSpec((d_model, n_head * d_v), lambda i: (0, 0)),       # Wv
            pl.BlockSpec((n_head * d_v, d_model), lambda i: (0, 0)),       # fc weight
            pl.BlockSpec((1, d_model), lambda i: (0, 0)),                  # fc bias
            pl.BlockSpec((1, d_model), lambda i: (0, 0)),                  # LN gamma
            pl.BlockSpec((1, d_model), lambda i: (0, 0)),                  # LN beta
        ],
        out_specs=pl.BlockSpec((bb, len_q, d_model), lambda i: (i, 0, 0)),
    )

    return pl.pallas_call(
        kernel,
        out_shape=jax.ShapeDtypeStruct((B, len_q, d_model), q.dtype),
        grid_spec=grid_spec,
        compiler_params=pltpu.CompilerParams(
            dimension_semantics=("parallel",)),   # v7x: 2 TCs split the batch-block axis
    )(q, k, v,
      prepared["wq_all"], prepared["wk_all"], prepared["wv_all"],
      prepared["fcw_all"], prepared["fcb"], prepared["ln_g"], prepared["ln_b"])


def reference_mha(q, k, v, params, *, n_head, d_k, d_v):
    """Pure-JAX reference mirroring the PyTorch forward (eval mode)."""
    B, L, d_model = q.shape
    wq = params["w_qs"].reshape(n_head, d_k, d_model).transpose(0, 2, 1)
    wk = params["w_ks"].reshape(n_head, d_k, d_model).transpose(0, 2, 1)
    wv = params["w_vs"].reshape(n_head, d_v, d_model).transpose(0, 2, 1)
    fcw = params["fc_w"].reshape(d_model, n_head, d_v).transpose(1, 2, 0)

    qh = jnp.einsum("bld,hdk->hblk", q, wq)
    kh = jnp.einsum("bld,hdk->hblk", k, wk)
    vh = jnp.einsum("bld,hdk->hblk", v, wv)
    scores = jnp.einsum("hbqk,hbik->hbqi", qh, kh) / np.power(d_k, 0.5)
    attn = jax.nn.softmax(scores, axis=-1)
    out = jnp.einsum("hbqi,hbiv->hbqv", attn, vh)
    y = jnp.einsum("hbqv,hvd->bqd", out, fcw) + params["fc_b"]
    y = y + q
    mean = y.mean(-1, keepdims=True)
    var = ((y - mean) ** 2).mean(-1, keepdims=True)
    return (y - mean) / jnp.sqrt(var + 1e-5) * params["ln_g"] + params["ln_b"]


if __name__ == "__main__":
    # Small shapes consistent with the module's forward.
    B, L, d_model = 2, 8, 32
    n_head, d_k, d_v = 4, 16, 16

    key = jax.random.PRNGKey(0)
    ks = jax.random.split(key, 8)

    std_qk = np.sqrt(2.0 / (d_model + d_k))
    std_v = np.sqrt(2.0 / (d_model + d_v))
    xavier_fc = np.sqrt(2.0 / (d_model + n_head * d_v))

    params = {
        "w_qs": jax.random.normal(ks[0], (n_head * d_k, d_model), jnp.float32) * std_qk,
        "w_ks": jax.random.normal(ks[1], (n_head * d_k, d_model), jnp.float32) * std_qk,
        "w_vs": jax.random.normal(ks[2], (n_head * d_v, d_model), jnp.float32) * std_v,
        "fc_w": jax.random.normal(ks[3], (d_model, n_head * d_v), jnp.float32) * xavier_fc,
        "fc_b": jax.random.normal(ks[4], (d_model,), jnp.float32) * 0.01,
        "ln_g": jnp.ones((d_model,), jnp.float32),
        "ln_b": jnp.zeros((d_model,), jnp.float32),
    }

    q = jax.random.normal(ks[5], (B, L, d_model), jnp.float32)
    k = jax.random.normal(ks[6], (B, L, d_model), jnp.float32)
    v = jax.random.normal(ks[7], (B, L, d_model), jnp.float32)

    # One-time layout conversion (hoisted out of the per-call path).
    prepared = prepare_mha_params(params, n_head=n_head, d_k=d_k, d_v=d_v,
                                  d_model=d_model)

    out = multi_head_attention(q, k, v, prepared, n_head=n_head, d_k=d_k, d_v=d_v)
    out = jax.block_until_ready(out)

    ref = reference_mha(q, k, v, params, n_head=n_head, d_k=d_k, d_v=d_v)
    # Slightly looser tolerance: the softmax denominator uses the EUP approximate
    # reciprocal (pl.reciprocal(approx=True)).
    np.testing.assert_allclose(np.asarray(out), np.asarray(ref), rtol=5e-3, atol=5e-3)

    print("KERNEL_OK")
</pallas_src>

<mosaic_0001>
module attributes {stable_mosaic.version = 11 : i64} {
  func.func @_mha_kernel(%arg0: i32, %arg1: memref<2x8x32xf32, #tpu.memory_space<vmem>>, %arg2: memref<2x8x32xf32, #tpu.memory_space<vmem>>, %arg3: memref<2x8x32xf32, #tpu.memory_space<vmem>>, %arg4: memref<32x64xf32, #tpu.memory_space<vmem>>, %arg5: memref<32x64xf32, #tpu.memory_space<vmem>>, %arg6: memref<32x64xf32, #tpu.memory_space<vmem>>, %arg7: memref<64x32xf32, #tpu.memory_space<vmem>>, %arg8: memref<1x32xf32, #tpu.memory_space<vmem>>, %arg9: memref<1x32xf32, #tpu.memory_space<vmem>>, %arg10: memref<1x32xf32, #tpu.memory_space<vmem>>, %arg11: memref<2x8x32xf32, #tpu.memory_space<vmem>>) attributes {dimension_semantics = [#tpu.dimension_semantics<parallel>], iteration_bounds = array<i64: 1>, scalar_prefetch = 0 : i64, scratch_operands = 0 : i64, tpu.core_type = #tpu.core_type<tc>, window_params = [{transform_indices = @transform_0, window_bounds = array<i64: 2, 8, 32>}, {transform_indices = @transform_1, window_bounds = array<i64: 2, 8, 32>}, {transform_indices = @transform_2, window_bounds = array<i64: 2, 8, 32>}, {pipeline_mode = #tpu.pipeline_mode<synchronous>, transform_indices = @transform_3, window_bounds = array<i64: 32, 64>}, {pipeline_mode = #tpu.pipeline_mode<synchronous>, transform_indices = @transform_4, window_bounds = array<i64: 32, 64>}, {pipeline_mode = #tpu.pipeline_mode<synchronous>, transform_indices = @transform_5, window_bounds = array<i64: 32, 64>}, {pipeline_mode = #tpu.pipeline_mode<synchronous>, transform_indices = @transform_6, window_bounds = array<i64: 64, 32>}, {pipeline_mode = #tpu.pipeline_mode<synchronous>, transform_indices = @transform_7, window_bounds = array<i64: 1, 32>}, {pipeline_mode = #tpu.pipeline_mode<synchronous>, transform_indices = @transform_8, window_bounds = array<i64: 1, 32>}, {pipeline_mode = #tpu.pipeline_mode<synchronous>, transform_indices = @transform_9, window_bounds = array<i64: 1, 32>}, {transform_indices = @transform_10, window_bounds = array<i64: 2, 8, 32>}]} {
    %c0 = arith.constant 0 : index
    %c0_0 = arith.constant 0 : index
    %c0_1 = arith.constant 0 : index
    %0 = vector.load %arg1[%c0, %c0_0, %c0_1] : memref<2x8x32xf32, #tpu.memory_space<vmem>>, vector<2x8x32xf32>
    %1 = vector.shape_cast %0 : vector<2x8x32xf32> to vector<16x32xf32>
    %c0_2 = arith.constant 0 : index
    %c0_3 = arith.constant 0 : index
    %c0_4 = arith.constant 0 : index
    %2 = vector.load %arg2[%c0_2, %c0_3, %c0_4] : memref<2x8x32xf32, #tpu.memory_space<vmem>>, vector<2x8x32xf32>
    %3 = vector.shape_cast %2 : vector<2x8x32xf32> to vector<16x32xf32>
    %c0_5 = arith.constant 0 : index
    %c0_6 = arith.constant 0 : index
    %c0_7 = arith.constant 0 : index
    %4 = vector.load %arg3[%c0_5, %c0_6, %c0_7] : memref<2x8x32xf32, #tpu.memory_space<vmem>>, vector<2x8x32xf32>
    %5 = vector.shape_cast %4 : vector<2x8x32xf32> to vector<16x32xf32>
    %c0_8 = arith.constant 0 : index
    %c0_9 = arith.constant 0 : index
    %6 = vector.load %arg4[%c0_8, %c0_9] : memref<32x64xf32, #tpu.memory_space<vmem>>, vector<32x64xf32>
    %cst = arith.constant dense<0.000000e+00> : vector<16x64xf32>
    %7 = tpu.matmul %1, %6, %cst {dimension_numbers = #tpu.dot_dimension_numbers<[1], [0], [0], [1], [0, 0, 1, 1], [], []>} : vector<16x32xf32>, vector<32x64xf32>, vector<16x64xf32> -> vector<16x64xf32>
    %c0_10 = arith.constant 0 : index
    %c0_11 = arith.constant 0 : index
    %8 = vector.load %arg5[%c0_10, %c0_11] : memref<32x64xf32, #tpu.memory_space<vmem>>, vector<32x64xf32>
    %cst_12 = arith.constant dense<0.000000e+00> : vector<16x64xf32>
    %9 = tpu.matmul %3, %8, %cst_12 {dimension_numbers = #tpu.dot_dimension_numbers<[1], [0], [0], [1], [0, 0, 1, 1], [], []>} : vector<16x32xf32>, vector<32x64xf32>, vector<16x64xf32> -> vector<16x64xf32>
    %c0_13 = arith.constant 0 : index
    %c0_14 = arith.constant 0 : index
    %10 = vector.load %arg6[%c0_13, %c0_14] : memref<32x64xf32, #tpu.memory_space<vmem>>, vector<32x64xf32>
    %cst_15 = arith.constant dense<0.000000e+00> : vector<16x64xf32>
    %11 = tpu.matmul %5, %10, %cst_15 {dimension_numbers = #tpu.dot_dimension_numbers<[1], [0], [0], [1], [0, 0, 1, 1], [], []>} : vector<16x32xf32>, vector<32x64xf32>, vector<16x64xf32> -> vector<16x64xf32>
    %12 = vector.extract_strided_slice %7 {offsets = [0, 0], sizes = [16, 16], strides = [1, 1]} : vector<16x64xf32> to vector<16x16xf32>
    %13 = vector.shape_cast %12 : vector<16x16xf32> to vector<2x8x16xf32>
    %14 = vector.extract_strided_slice %9 {offsets = [0, 0], sizes = [16, 16], strides = [1, 1]} : vector<16x64xf32> to vector<16x16xf32>
    %15 = vector.shape_cast %14 : vector<16x16xf32> to vector<2x8x16xf32>
    %16 = vector.extract_strided_slice %11 {offsets = [0, 0], sizes = [16, 16], strides = [1, 1]} : vector<16x64xf32> to vector<16x16xf32>
    %17 = vector.shape_cast %16 : vector<16x16xf32> to vector<2x8x16xf32>
    "tpu.trace_start"() <{level = 10 : i32, message = "bqd,bkd->bqk"}> : () -> ()
    %cst_16 = arith.constant dense<0.000000e+00> : vector<2x8x8xf32>
    %18 = tpu.matmul %13, %15, %cst_16 {dimension_numbers = #tpu.dot_dimension_numbers<[2], [2], [1], [1], [0, 0, 0, 1, 1, 1], [0], [0]>} : vector<2x8x16xf32>, vector<2x8x16xf32>, vector<2x8x8xf32> -> vector<2x8x8xf32>
    "tpu.trace_stop"() : () -> ()
    %cst_17 = arith.constant 2.500000e-01 : f32
    %19 = vector.broadcast %cst_17 : f32 to vector<2x8x8xf32>
    %20 = arith.mulf %18, %19 : vector<2x8x8xf32>
    %cst_18 = arith.constant dense<0xFF800000> : vector<2x8xf32>
    %21 = vector.multi_reduction <maximumf>, %20, %cst_18 [2] : vector<2x8x8xf32> to vector<2x8xf32>
    %22 = vector.shape_cast %21 : vector<2x8xf32> to vector<2x8x1xf32>
    %23 = vector.broadcast %22 : vector<2x8x1xf32> to vector<2x8x8xf32>
    %24 = arith.subf %20, %23 : vector<2x8x8xf32>
    %25 = math.exp %24 : vector<2x8x8xf32>
    %cst_19 = arith.constant dense<0.000000e+00> : vector<2x8xf32>
    %26 = vector.multi_reduction <add>, %25, %cst_19 [2] : vector<2x8x8xf32> to vector<2x8xf32>
    %27 = vector.shape_cast %26 : vector<2x8xf32> to vector<2x8x1xf32>
    %28 = tpu.reciprocal %27 {approx = true} : vector<2x8x1xf32> -> vector<2x8x1xf32>
    %29 = vector.broadcast %28 : vector<2x8x1xf32> to vector<2x8x8xf32>
    %30 = arith.mulf %25, %29 : vector<2x8x8xf32>
    "tpu.trace_start"() <{level = 10 : i32, message = "bqk,bkd->bqd"}> : () -> ()
    %cst_20 = arith.constant dense<0.000000e+00> : vector<2x8x16xf32>
    %31 = tpu.matmul %30, %17, %cst_20 {dimension_numbers = #tpu.dot_dimension_numbers<[2], [1], [1], [2], [0, 0, 0, 1, 1, 2], [0], [0]>} : vector<2x8x8xf32>, vector<2x8x16xf32>, vector<2x8x16xf32> -> vector<2x8x16xf32>
    "tpu.trace_stop"() : () -> ()
    %32 = vector.shape_cast %31 : vector<2x8x16xf32> to vector<16x16xf32>
    %33 = vector.extract_strided_slice %7 {offsets = [0, 16], sizes = [16, 16], strides = [1, 1]} : vector<16x64xf32> to vector<16x16xf32>
    %34 = vector.shape_cast %33 : vector<16x16xf32> to vector<2x8x16xf32>
    %35 = vector.extract_strided_slice %9 {offsets = [0, 16], sizes = [16, 16], strides = [1, 1]} : vector<16x64xf32> to vector<16x16xf32>
    %36 = vector.shape_cast %35 : vector<16x16xf32> to vector<2x8x16xf32>
    %37 = vector.extract_strided_slice %11 {offsets = [0, 16], sizes = [16, 16], strides = [1, 1]} : vector<16x64xf32> to vector<16x16xf32>
    %38 = vector.shape_cast %37 : vector<16x16xf32> to vector<2x8x16xf32>
    "tpu.trace_start"() <{level = 10 : i32, message = "bqd,bkd->bqk"}> : () -> ()
    %cst_21 = arith.constant dense<0.000000e+00> : vector<2x8x8xf32>
    %39 = tpu.matmul %34, %36, %cst_21 {dimension_numbers = #tpu.dot_dimension_numbers<[2], [2], [1], [1], [0, 0, 0, 1, 1, 1], [0], [0]>} : vector<2x8x16xf32>, vector<2x8x16xf32>, vector<2x8x8xf32> -> vector<2x8x8xf32>
    "tpu.trace_stop"() : () -> ()
    %cst_22 = arith.constant 2.500000e-01 : f32
    %40 = vector.broadcast %cst_22 : f32 to vector<2x8x8xf32>
    %41 = arith.mulf %39, %40 : vector<2x8x8xf32>
    %cst_23 = arith.constant dense<0xFF800000> : vector<2x8xf32>
    %42 = vector.multi_reduction <maximumf>, %41, %cst_23 [2] : vector<2x8x8xf32> to vector<2x8xf32>
    %43 = vector.shape_cast %42 : vector<2x8xf32> to vector<2x8x1xf32>
    %44 = vector.broadcast %43 : vector<2x8x1xf32> to vector<2x8x8xf32>
    %45 = arith.subf %41, %44 : vector<2x8x8xf32>
    %46 = math.exp %45 : vector<2x8x8xf32>
    %cst_24 = arith.constant dense<0.000000e+00> : vector<2x8xf32>
    %47 = vector.multi_reduction <add>, %46, %cst_24 [2] : vector<2x8x8xf32> to vector<2x8xf32>
    %48 = vector.shape_cast %47 : vector<2x8xf32> to vector<2x8x1xf32>
    %49 = tpu.reciprocal %48 {approx = true} : vector<2x8x1xf32> -> vector<2x8x1xf32>
    %50 = vector.broadcast %49 : vector<2x8x1xf32> to vector<2x8x8xf32>
    %51 = arith.mulf %46, %50 : vector<2x8x8xf32>
    "tpu.trace_start"() <{level = 10 : i32, message = "bqk,bkd->bqd"}> : () -> ()
    %cst_25 = arith.constant dense<0.000000e+00> : vector<2x8x16xf32>
    %52 = tpu.matmul %51, %38, %cst_25 {dimension_numbers = #tpu.dot_dimension_numbers<[2], [1], [1], [2], [0, 0, 0, 1, 1, 2], [0], [0]>} : vector<2x8x8xf32>, vector<2x8x16xf32>, vector<2x8x16xf32> -> vector<2x8x16xf32>
    "tpu.trace_stop"() : () -> ()
    %53 = vector.shape_cast %52 : vector<2x8x16xf32> to vector<16x16xf32>
    %54 = vector.extract_strided_slice %7 {offsets = [0, 32], sizes = [16, 16], strides = [1, 1]} : vector<16x64xf32> to vector<16x16xf32>
    %55 = vector.shape_cast %54 : vector<16x16xf32> to vector<2x8x16xf32>
    %56 = vector.extract_strided_slice %9 {offsets = [0, 32], sizes = [16, 16], strides = [1, 1]} : vector<16x64xf32> to vector<16x16xf32>
    %57 = vector.shape_cast %56 : vector<16x16xf32> to vector<2x8x16xf32>
    %58 = vector.extract_strided_slice %11 {offsets = [0, 32], sizes = [16, 16], strides = [1, 1]} : vector<16x64xf32> to vector<16x16xf32>
    %59 = vector.shape_cast %58 : vector<16x16xf32> to vector<2x8x16xf32>
    "tpu.trace_start"() <{level = 10 : i32, message = "bqd,bkd->bqk"}> : () -> ()
    %cst_26 = arith.constant dense<0.000000e+00> : vector<2x8x8xf32>
    %60 = tpu.matmul %55, %57, %cst_26 {dimension_numbers = #tpu.dot_dimension_numbers<[2], [2], [1], [1], [0, 0, 0, 1, 1, 1], [0], [0]>} : vector<2x8x16xf32>, vector<2x8x16xf32>, vector<2x8x8xf32> -> vector<2x8x8xf32>
    "tpu.trace_stop"() : () -> ()
    %cst_27 = arith.constant 2.500000e-01 : f32
    %61 = vector.broadcast %cst_27 : f32 to vector<2x8x8xf32>
    %62 = arith.mulf %60, %61 : vector<2x8x8xf32>
    %cst_28 = arith.constant dense<0xFF800000> : vector<2x8xf32>
    %63 = vector.multi_reduction <maximumf>, %62, %cst_28 [2] : vector<2x8x8xf32> to vector<2x8xf32>
    %64 = vector.shape_cast %63 : vector<2x8xf32> to vector<2x8x1xf32>
    %65 = vector.broadcast %64 : vector<2x8x1xf32> to vector<2x8x8xf32>
    %66 = arith.subf %62, %65 : vector<2x8x8xf32>
    %67 = math.exp %66 : vector<2x8x8xf32>
    %cst_29 = arith.constant dense<0.000000e+00> : vector<2x8xf32>
    %68 = vector.multi_reduction <add>, %67, %cst_29 [2] : vector<2x8x8xf32> to vector<2x8xf32>
    %69 = vector.shape_cast %68 : vector<2x8xf32> to vector<2x8x1xf32>
    %70 = tpu.reciprocal %69 {approx = true} : vector<2x8x1xf32> -> vector<2x8x1xf32>
    %71 = vector.broadcast %70 : vector<2x8x1xf32> to vector<2x8x8xf32>
    %72 = arith.mulf %67, %71 : vector<2x8x8xf32>
    "tpu.trace_start"() <{level = 10 : i32, message = "bqk,bkd->bqd"}> : () -> ()
    %cst_30 = arith.constant dense<0.000000e+00> : vector<2x8x16xf32>
    %73 = tpu.matmul %72, %59, %cst_30 {dimension_numbers = #tpu.dot_dimension_numbers<[2], [1], [1], [2], [0, 0, 0, 1, 1, 2], [0], [0]>} : vector<2x8x8xf32>, vector<2x8x16xf32>, vector<2x8x16xf32> -> vector<2x8x16xf32>
    "tpu.trace_stop"() : () -> ()
    %74 = vector.shape_cast %73 : vector<2x8x16xf32> to vector<16x16xf32>
    %75 = vector.extract_strided_slice %7 {offsets = [0, 48], sizes = [16, 16], strides = [1, 1]} : vector<16x64xf32> to vector<16x16xf32>
    %76 = vector.shape_cast %75 : vector<16x16xf32> to vector<2x8x16xf32>
    %77 = vector.extract_strided_slice %9 {offsets = [0, 48], sizes = [16, 16], strides = [1, 1]} : vector<16x64xf32> to vector<16x16xf32>
    %78 = vector.shape_cast %77 : vector<16x16xf32> to vector<2x8x16xf32>
    %79 = vector.extract_strided_slice %11 {offsets = [0, 48], sizes = [16, 16], strides = [1, 1]} : vector<16x64xf32> to vector<16x16xf32>
    %80 = vector.shape_cast %79 : vector<16x16xf32> to vector<2x8x16xf32>
    "tpu.trace_start"() <{level = 10 : i32, message = "bqd,bkd->bqk"}> : () -> ()
    %cst_31 = arith.constant dense<0.000000e+00> : vector<2x8x8xf32>
    %81 = tpu.matmul %76, %78, %cst_31 {dimension_numbers = #tpu.dot_dimension_numbers<[2], [2], [1], [1], [0, 0, 0, 1, 1, 1], [0], [0]>} : vector<2x8x16xf32>, vector<2x8x16xf32>, vector<2x8x8xf32> -> vector<2x8x8xf32>
    "tpu.trace_stop"() : () -> ()
    %cst_32 = arith.constant 2.500000e-01 : f32
    %82 = vector.broadcast %cst_32 : f32 to vector<2x8x8xf32>
    %83 = arith.mulf %81, %82 : vector<2x8x8xf32>
    %cst_33 = arith.constant dense<0xFF800000> : vector<2x8xf32>
    %84 = vector.multi_reduction <maximumf>, %83, %cst_33 [2] : vector<2x8x8xf32> to vector<2x8xf32>
    %85 = vector.shape_cast %84 : vector<2x8xf32> to vector<2x8x1xf32>
    %86 = vector.broadcast %85 : vector<2x8x1xf32> to vector<2x8x8xf32>
    %87 = arith.subf %83, %86 : vector<2x8x8xf32>
    %88 = math.exp %87 : vector<2x8x8xf32>
    %cst_34 = arith.constant dense<0.000000e+00> : vector<2x8xf32>
    %89 = vector.multi_reduction <add>, %88, %cst_34 [2] : vector<2x8x8xf32> to vector<2x8xf32>
    %90 = vector.shape_cast %89 : vector<2x8xf32> to vector<2x8x1xf32>
    %91 = tpu.reciprocal %90 {approx = true} : vector<2x8x1xf32> -> vector<2x8x1xf32>
    %92 = vector.broadcast %91 : vector<2x8x1xf32> to vector<2x8x8xf32>
    %93 = arith.mulf %88, %92 : vector<2x8x8xf32>
    "tpu.trace_start"() <{level = 10 : i32, message = "bqk,bkd->bqd"}> : () -> ()
    %cst_35 = arith.constant dense<0.000000e+00> : vector<2x8x16xf32>
    %94 = tpu.matmul %93, %80, %cst_35 {dimension_numbers = #tpu.dot_dimension_numbers<[2], [1], [1], [2], [0, 0, 0, 1, 1, 2], [0], [0]>} : vector<2x8x8xf32>, vector<2x8x16xf32>, vector<2x8x16xf32> -> vector<2x8x16xf32>
    "tpu.trace_stop"() : () -> ()
    %95 = vector.shape_cast %94 : vector<2x8x16xf32> to vector<16x16xf32>
    %96 = tpu.concatenate %32, %53, %74, %95 in 1 : vector<16x16xf32>, vector<16x16xf32>, vector<16x16xf32>, vector<16x16xf32> -> vector<16x64xf32>
    %c0_36 = arith.constant 0 : index
    %c0_37 = arith.constant 0 : index
    %97 = vector.load %arg7[%c0_36, %c0_37] : memref<64x32xf32, #tpu.memory_space<vmem>>, vector<64x32xf32>
    %cst_38 = arith.constant dense<0.000000e+00> : vector<16x32xf32>
    %98 = tpu.matmul %96, %97, %cst_38 {dimension_numbers = #tpu.dot_dimension_numbers<[1], [0], [0], [1], [0, 0, 1, 1], [], []>} : vector<16x64xf32>, vector<64x32xf32>, vector<16x32xf32> -> vector<16x32xf32>
    %c0_39 = arith.constant 0 : index
    %c0_40 = arith.constant 0 : index
    %99 = vector.load %arg8[%c0_39, %c0_40] : memref<1x32xf32, #tpu.memory_space<vmem>>, vector<1x32xf32>
    %100 = vector.broadcast %99 : vector<1x32xf32> to vector<16x32xf32>
    %101 = arith.addf %98, %100 : vector<16x32xf32>
    %102 = arith.addf %101, %1 : vector<16x32xf32>
    %cst_41 = arith.constant dense<0.000000e+00> : vector<16xf32>
    %103 = vector.multi_reduction <add>, %102, %cst_41 [1] : vector<16x32xf32> to vector<16xf32>
    %104 = vector.shape_cast %103 : vector<16xf32> to vector<16x1xf32>
    %cst_42 = arith.constant 3.200000e+01 : f32
    %105 = vector.broadcast %cst_42 : f32 to vector<16x1xf32>
    %106 = arith.divf %104, %105 : vector<16x1xf32>
    %107 = vector.broadcast %106 : vector<16x1xf32> to vector<16x32xf32>
    %108 = arith.subf %102, %107 : vector<16x32xf32>
    %109 = arith.mulf %108, %108 : vector<16x32xf32>
    %cst_43 = arith.constant dense<0.000000e+00> : vector<16xf32>
    %110 = vector.multi_reduction <add>, %109, %cst_43 [1] : vector<16x32xf32> to vector<16xf32>
    %111 = vector.shape_cast %110 : vector<16xf32> to vector<16x1xf32>
    %cst_44 = arith.constant 3.200000e+01 : f32
    %112 = vector.broadcast %cst_44 : f32 to vector<16x1xf32>
    %113 = arith.divf %111, %112 : vector<16x1xf32>
    %114 = vector.broadcast %106 : vector<16x1xf32> to vector<16x32xf32>
    %115 = arith.subf %102, %114 : vector<16x32xf32>
    %cst_45 = arith.constant 9.99999974E-6 : f32
    %116 = vector.broadcast %cst_45 : f32 to vector<16x1xf32>
    %117 = arith.addf %113, %116 : vector<16x1xf32>
    %118 = math.rsqrt %117 : vector<16x1xf32>
    %119 = vector.broadcast %118 : vector<16x1xf32> to vector<16x32xf32>
    %120 = arith.mulf %115, %119 : vector<16x32xf32>
    %c0_46 = arith.constant 0 : index
    %c0_47 = arith.constant 0 : index
    %121 = vector.load %arg9[%c0_46, %c0_47] : memref<1x32xf32, #tpu.memory_space<vmem>>, vector<1x32xf32>
    %122 = vector.broadcast %121 : vector<1x32xf32> to vector<16x32xf32>
    %123 = arith.mulf %120, %122 : vector<16x32xf32>
    %c0_48 = arith.constant 0 : index
    %c0_49 = arith.constant 0 : index
    %124 = vector.load %arg10[%c0_48, %c0_49] : memref<1x32xf32, #tpu.memory_space<vmem>>, vector<1x32xf32>
    %125 = vector.broadcast %124 : vector<1x32xf32> to vector<16x32xf32>
    %126 = arith.addf %123, %125 : vector<16x32xf32>
    %127 = vector.shape_cast %126 : vector<16x32xf32> to vector<2x8x32xf32>
    %c0_50 = arith.constant 0 : index
    %c0_51 = arith.constant 0 : index
    %c0_52 = arith.constant 0 : index
    %128 = vector.load %arg11[%c0_50, %c0_51, %c0_52] : memref<2x8x32xf32, #tpu.memory_space<vmem>>, vector<2x8x32xf32>
    tpu.vector_store %arg11[%c0_50, %c0_51, %c0_52], %127 {strides = array<i32>} : memref<2x8x32xf32, #tpu.memory_space<vmem>>, vector<2x8x32xf32>,
    return
  }
  func.func @transform_0(%arg0: i32) -> (i32, i32, i32) {
    %c0_i32 = arith.constant 0 : i32
    %c0_i32_0 = arith.constant 0 : i32
    %c0_i32_1 = arith.constant 0 : i32
    return %arg0, %c0_i32, %c0_i32_0 : i32, i32, i32
  }
  func.func @transform_1(%arg0: i32) -> (i32, i32, i32) {
    %c0_i32 = arith.constant 0 : i32
    %c0_i32_0 = arith.constant 0 : i32
    %c0_i32_1 = arith.constant 0 : i32
    return %arg0, %c0_i32, %c0_i32_0 : i32, i32, i32
  }
  func.func @transform_2(%arg0: i32) -> (i32, i32, i32) {
    %c0_i32 = arith.constant 0 : i32
    %c0_i32_0 = arith.constant 0 : i32
    %c0_i32_1 = arith.constant 0 : i32
    return %arg0, %c0_i32, %c0_i32_0 : i32, i32, i32
  }
  func.func @transform_3(%arg0: i32) -> (i32, i32) {
    %c0_i32 = arith.constant 0 : i32
    %c0_i32_0 = arith.constant 0 : i32
    %c0_i32_1 = arith.constant 0 : i32
    return %c0_i32, %c0_i32_0 : i32, i32
  }
  func.func @transform_4(%arg0: i32) -> (i32, i32) {
    %c0_i32 = arith.constant 0 : i32
    %c0_i32_0 = arith.constant 0 : i32
    %c0_i32_1 = arith.constant 0 : i32
    return %c0_i32, %c0_i32_0 : i32, i32
  }
  func.func @transform_5(%arg0: i32) -> (i32, i32) {
    %c0_i32 = arith.constant 0 : i32
    %c0_i32_0 = arith.constant 0 : i32
    %c0_i32_1 = arith.constant 0 : i32
    return %c0_i32, %c0_i32_0 : i32, i32
  }
  func.func @transform_6(%arg0: i32) -> (i32, i32) {
    %c0_i32 = arith.constant 0 : i32
    %c0_i32_0 = arith.constant 0 : i32
    %c0_i32_1 = arith.constant 0 : i32
    return %c0_i32, %c0_i32_0 : i32, i32
  }
  func.func @transform_7(%arg0: i32) -> (i32, i32) {
    %c0_i32 = arith.constant 0 : i32
    %c0_i32_0 = arith.constant 0 : i32
    %c0_i32_1 = arith.constant 0 : i32
    return %c0_i32, %c0_i32_0 : i32, i32
  }
  func.func @transform_8(%arg0: i32) -> (i32, i32) {
    %c0_i32 = arith.constant 0 : i32
    %c0_i32_0 = arith.constant 0 : i32
    %c0_i32_1 = arith.constant 0 : i32
    return %c0_i32, %c0_i32_0 : i32, i32
  }
  func.func @transform_9(%arg0: i32) -> (i32, i32) {
    %c0_i32 = arith.constant 0 : i32
    %c0_i32_0 = arith.constant 0 : i32
    %c0_i32_1 = arith.constant 0 : i32
    return %c0_i32, %c0_i32_0 : i32, i32
  }
  func.func @transform_10(%arg0: i32) -> (i32, i32, i32) {
    %c0_i32 = arith.constant 0 : i32
    %c0_i32_0 = arith.constant 0 : i32
    %c0_i32_1 = arith.constant 0 : i32
    return %arg0, %c0_i32, %c0_i32_0 : i32, i32, i32
  }
}

</mosaic_0001>

<bundles_post_ra>
// kernel: tpu_custom_call.1
= control target key start
LH: loop header
LB: loop body
LE: loop exit
PB: predicated region body
PF: predicated region fallthrough
CT: control target
= control target key end

     0   :  { %15 = vsyncpa [#allocation3], 0  ;;  %s1318_s0 = inlined_call_operand.hbm [shape: f32[2,8,32], index: 0, kind: input, shape index: {}]   ;;  %s1319_s1 = inlined_call_operand.hbm [shape: f32[2,8,32], index: 1, kind: input, shape index: {}]   ;;  %s1320_s2 = inlined_call_operand.hbm [shape: f32[2,8,32], index: 2, kind: input, shape index: {}]   ;;  %s1321_s3 = inlined_call_operand.vmem [shape: f32[32,64], index: 3, kind: input, shape index: {}]   ;;  %s1322_s4 = inlined_call_operand.vmem [shape: f32[32,64], index: 4, kind: input, shape index: {}]   ;;  %s1323_s5 = inlined_call_operand.vmem [shape: f32[32,64], index: 5, kind: input, shape index: {}]   ;;  %s1324_s6 = inlined_call_operand.vmem [shape: f32[64,32], index: 6, kind: input, shape index: {}]   ;;  %s1325_s7 = inlined_call_operand.vmem [shape: f32[1,32], index: 7, kind: input, shape index: {}]   ;;  %s1326_s8 = inlined_call_operand.vmem [shape: f32[1,32], index: 8, kind: input, shape index: {}]   ;;  %s1327_s9 = inlined_call_operand.vmem [shape: f32[1,32], index: 9, kind: input, shape index: {}]   ;;  %s1328_s10 = inlined_call_operand.hbm [shape: f32[2,8,32], index: 10, kind: output, shape index: {}]  }
   0x1   :  { %16 = vsyncpa [#allocation6], 0 }
   0x2   :  { %17 = vsyncpa [#allocation4], 0  ;;  %s35_s15 = sshll.u32 %s1319_s1, 4  ;;  %s1064_s16 = smov [#allocation5]   ;;  %s36_s15 = int_to_ptr.hbm [resolvable:$true] %s35_s15 }
   0x3   :  { %s37_s17 = sshll.u32 %s1064_s16, 4  ;;  %s22_s20 = sshll.u32 %s1318_s0, 4  ;;  %s38_s17 = int_to_ptr.vmem [resolvable:$true] %s37_s17  ;;  %s23_s20 = int_to_ptr.hbm [resolvable:$true] %s22_s20 }
   0x4   :  { %s1065_s21 = smov 128   ;;  %s1066_s22 = smov 8  }
   0x5   :  { %43 = dma.hbm_to_vmem [thread:$0]  %s36_s15, 256, %s38_s17, [#allocation6], %s1065_s21, %s1065_s21, %s1066_s22  }
   0x6   :  { %s1067_s23 = smov [#allocation2]   ;;  %s48_s1 = sshll.u32 %s1320_s2, 4  ;;  %s49_s1 = int_to_ptr.hbm [resolvable:$true] %s48_s1 }
   0x7   :  { %s24_s24 = sshll.u32 %s1067_s23, 4  ;;  %s1068_s0 = smov [#allocation7]   ;;  %s25_s24 = int_to_ptr.vmem [resolvable:$true] %s24_s24 }
   0x8   :  { %30 = dma.hbm_to_vmem [thread:$0]  %s23_s20, 256, %s25_s24, [#allocation3], %s1065_s21, %s1065_s21, %s1066_s22  }
   0x9   :  { %s50_s27 = sshll.u32 %s1068_s0, 4  ;;  %s51_s27 = int_to_ptr.vmem [resolvable:$true] %s50_s27 }
   0xa   :  { %56 = dma.hbm_to_vmem [thread:$0]  %s49_s1, 256, %s51_s27, [#allocation6], %s1065_s21, %s1065_s21, %s1066_s22  }
   0xb   :  { %1058 = dma.done.wait [#allocation3], 256  }
   0xc   :  { %1059 = vsyncadd [#allocation3], 4294967040 }
   0xd   :  { %1060 = dma.done.wait [#allocation6], 512  }
   0xe   :  { %1061 = vsyncadd [#allocation6], 4294966784  ;;  %v126_v0 = vld [vmem:[%s1322_s4 + $0x18] sm:$0xff]  ;;  %v125_v1 = vld [vmem:[%s1322_s4 + $0x10] sm:$0xff]  ;;  %vm93_vm0 = vcmask 261120   ;;  %vm189_vm1 = vcmask 130048  }
   0xf   :  { %145 = vmatpush.msra.mxu2 %v126_v0  ;;  %v92_v2 = vld [vmem:[%s1321_s3 + $0x18] sm:$0xff]  ;;  %v124_v3 = vld [vmem:[%s1322_s4 + $0x8] sm:$0xff]  ;;  %v91_v4 = vld [vmem:[%s1321_s3 + $0x10] sm:$0xff]  ;;  %s1071_s25 = smov 80   ;;  %vm244_vm2 = vcmask 64512   ;;  %s1073_s11 = smov 32  }
  0x10   :  { %112 = vmatpush.msra.mxu0 %v92_v2  ;;  %v123_v5 = vld [vmem:[%s1322_s4] sm:$0xff]  ;;  %v90_v6 = vld [vmem:[%s1321_s3 + $0x8] sm:$0xff]  ;;  %v85_v7 = vld [vmem:[#allocation5] sm:$0xff]  ;;  %s1070_s4 = smov 112   ;;  %s1074_s12 = smov 48   ;;  %vm739_vm3 = vcmask 392192  }
  0x11   :  { %146 = vmatpush.msra.mxu2 %v125_v1  ;;  %v89_v8 = vld [vmem:[%s1321_s3] sm:$0xff]  ;;  %v86_v10 = vld [vmem:[#allocation5 + $0x8] sm:$0xff]  ;;  %v1179_v11 = vld [vmem:[#allocation2 + $0x8] sm:$0xff]  ;;  %s1069_s3 = smov 96   ;;  %vm754_vm4 = vcmask 523264  }
  0x12   :  { %113 = vmatpush.msra.mxu0 %v91_v4  ;;  %v1174_v9 = vld [vmem:[#allocation2] sm:$0xff]  ;;  %v159_v16 = vld [vmem:[%s1323_s5 + $0x18] sm:$0xff]  ;;  %v158_v17 = vld [vmem:[%s1323_s5 + $0x10] sm:$0xff] }
  0x13   :  { %147 = vmatpush.msra.mxu2 %v124_v3  ;;  %v157_v18 = vld [vmem:[%s1323_s5 + $0x8] sm:$0xff]  ;;  %v156_v19 = vld [vmem:[%s1323_s5] sm:$0xff]  ;;  %s1072_s5 = smov 16  }
  0x14   :  { %114 = vmatpush.msra.mxu0 %v90_v6  ;;  %v87_v20 = vld [vmem:[#allocation7] sm:$0xff]  ;;  %v88_v21 = vld [vmem:[#allocation7 + $0x8] sm:$0xff] }
  0x15   :  { %148 = vmatpush.msra.mxu2 %v123_v5 }
  0x16   :  { %873 = vmatmul.msk.f32.vlgmr.msra.gmra.mxu2 %vm93_vm0, %v85_v7  ;;  %115 = vmatpush.msra.mxu0 %v89_v8 }
  0x17   :  { %871 = vmatmul.msk.f32.vlgmr.msra.gmra.mxu0 %vm93_vm0, %v1174_v9  ;;  %178 = vmatpush.msrb.mxu2 %v159_v16 }
  0x19   :  { %179 = vmatpush.msrb.mxu2 %v158_v17 }
  0x1b   :  { %180 = vmatpush.msrb.mxu2 %v157_v18 }
  0x1d   :  { %181 = vmatpush.msrb.mxu2 %v156_v19 }
  0x1e   :  { %874 = vmatmul.msk.f32.gmra.mxu2 %vm93_vm0, %v86_v10 }
  0x1f   :  { %872 = vmatmul.msk.f32.gmra.mxu0 %vm93_vm0, %v1179_v11 }
  0x26   :  { %875 = vmatmul.msk.f32.vlgmr.msrb.gmra.mxu2 %vm93_vm0, %v87_v20 }
  0x2e   :  { %876 = vmatmul.msk.f32.gmra.mxu2 %vm93_vm0, %v88_v21 }
  0x94   :  { %v117_v13 = vpop.f32.mrf.mxu0 }
  0x99   :  { %v150_v12 = vpop.f32.mrf.mxu2 }
  0x9a   :  { %449 = vrot.lane.b32.xlu2 %v150_v12, %s1069_s3  ;;  %315 = vrot.lane.b32.xlu0 %v150_v12, %s1070_s4 }
  0x9b   :  { %877 = vmatpush.xpose.msk.msra.mxu3 %vm189_vm1, %v150_v12 }
  0x9c   :  { %v120_v15 = vpop.f32.mrf.mxu0 }
  0x9e   :  { %878 = vmatmul.msk.f32.vlgmr.msra.gmra.mxu3 %vm189_vm1, %v117_v13 }
  0xa1   :  { %v153_v14 = vpop.f32.mrf.mxu2 }
  0xa2   :  { %343 = vrot.lane.b32.xlu1 %v153_v14, %s1070_s4  ;;  %879 = vmatpush.xpose.msk.msrb.mxu3 %vm189_vm1, %v153_v14 }
  0xa3   :  { %447 = vrot.lane.b32.xlu2 %v117_v13, %s1069_s3  ;;  %313 = vrot.lane.b32.xlu0 %v117_v13, %s1070_s4 }
  0xa6   :  { %880 = vmatmul.msk.f32.vlgmr.msrb.gmra.mxu3 %vm189_vm1, %v120_v15 }
  0xa9   :  { %v1228_v40 = vpop.f32.mrf.mxu2 }
  0xaa   :  { %341 = vrot.lane.b32.xlu1 %v120_v15, %s1070_s4  ;;  %285 = vmatpush.msra.mxu3 %v1228_v40 }
  0xab   :  { %477 = vrot.lane.b32.xlu0 %v153_v14, %s1069_s3  ;;  %475 = vrot.lane.b32.xlu2 %v120_v15, %s1069_s3 }
  0xb1   :  { %v1231_v41 = vpop.f32.mrf.mxu2 }
  0xb2   :  { %581 = vrot.lane.b32.xlu1 %v150_v12, %s1071_s25  ;;  %308 = vmatpush.msrb.mxu0 %v1231_v41 }
  0xb3   :  { %579 = vrot.lane.b32.xlu0 %v117_v13, %s1071_s25  ;;  %607 = vrot.lane.b32.xlu2 %v120_v15, %s1071_s25 }
  0xba   :  { %609 = vrot.lane.b32.xlu1 %v153_v14, %s1071_s25 }
  0xf4   :  { %v450_v22 = vpop.permute.xlu2 %449 }
  0xfd   :  { %v448_v26 = vpop.permute.xlu2 %447 }
 0x105   :  { %v476_v29 = vpop.permute.xlu2 %475 }
 0x10c   :  { %v316_v23 = vpop.permute.xlu0 %315 }
 0x10d   :  { %883 = vmatpush.xpose.msk.msra.mxu1 %vm189_vm1, %v316_v23  ;;  %v608_v39 = vpop.permute.xlu2 %607 }
 0x114   :  { %v344_v24 = vpop.permute.xlu1 %343 }
 0x115   :  { %v314_v25 = vpop.permute.xlu0 %313  ;;  %885 = vmatpush.xpose.msk.msrb.mxu1 %vm189_vm1, %v344_v24 }
 0x116   :  { %884 = vmatmul.msk.f32.vlgmr.msra.gmra.mxu1 %vm189_vm1, %v314_v25 }
 0x119   :  { %889 = vmatpush.xpose.msk.msra.mxu1 %vm189_vm1, %v450_v22 }
 0x11c   :  { %v342_v27 = vpop.permute.xlu1 %341 }
 0x11d   :  { %v478_v28 = vpop.permute.xlu0 %477 }
 0x11e   :  { %886 = vmatmul.msk.f32.vlgmr.msrb.gmra.mxu1 %vm189_vm1, %v342_v27  ;;  %891 = vmatpush.xpose.msk.msra.mxu2 %vm189_vm1, %v478_v28 }
 0x121   :  { %v213_v30 = vpop.f32.mrf.mxu3  ;;  %892 = vmatmul.msk.f32.vlgmr.msra.gmra.mxu2 %vm189_vm1, %v476_v29  ;;  %v916_v29 = vpack.i.bf16 %v1231_v41, %v1228_v40 }
 0x122   :  { %v242_v31 = vmul.f32 0.25, %v213_v30 }
 0x124   :  { %v245_v32 = vsel %vm244_vm2, %v242_v31, -inf  ;;  %v582_v33 = vpop.permute.xlu1 %581 }
 0x125   :  { %246 = vmax.xlane.f32.xlu0 %v245_v32  ;;  %895 = vmatpush.xpose.msk.msrb.mxu1 %vm189_vm1, %v582_v33  ;;  %v580_v38 = vpop.permute.xlu0 %579 }
 0x126   :  { %890 = vmatmul.msk.f32.vlgmr.msra.gmra.mxu1 %vm189_vm1, %v448_v26 }
 0x129   :  { %v239_v34 = vpop.f32.mrf.mxu3 }
 0x12a   :  { %v243_v35 = vmul.f32 0.25, %v239_v34 }
 0x12c   :  { %v610_v36 = vpop.permute.xlu1 %609  ;;  %v248_v37 = vsel %vm244_vm2, %v243_v35, -inf }
 0x12d   :  { %249 = vmax.xlane.f32.xlu2 %v248_v37  ;;  %897 = vmatpush.xpose.msk.msrb.mxu2 %vm189_vm1, %v610_v36 }
 0x12e   :  { %896 = vmatmul.msk.f32.vlgmr.msrb.gmra.mxu1 %vm189_vm1, %v580_v38 }
 0x130   :  { %898 = vmatmul.msk.f32.vlgmr.msrb.gmra.mxu2 %vm189_vm1, %v608_v39 }
 0x193   :  { %v338_v42 = vpop.f32.mrf.mxu1 }
 0x194   :  { %v369_v43 = vmul.f32 0.25, %v338_v42 }
 0x196   :  { %v371_v44 = vsel %vm244_vm2, %v369_v43, -inf }
 0x197   :  { %372 = vmax.xlane.f32.xlu1 %v371_v44 }
 0x198   :  { %v247_v45 = vpop.xlane.xlu0 %246 }
 0x199   :  { %v251_v46 = vsub.f32 %v242_v31, %v247_v45 }
 0x19b   :  { %v253_v47 = vmul.f32 1.442695, %v251_v46  ;;  %v366_v48 = vpop.f32.mrf.mxu1 }
 0x19c   :  { %v370_v49 = vmul.f32 0.25, %v366_v48 }
 0x19d   :  { %924 = vpow2.f32 %v253_v47 }
 0x19e   :  { %v374_v50 = vsel %vm244_vm2, %v370_v49, -inf }
 0x19f   :  { %375 = vmax.xlane.f32.xlu0 %v374_v50 }
 0x1a0   :  { %v250_v57 = vpop.xlane.xlu2 %249 }
 0x1a1   :  { %v252_v61 = vsub.f32 %v243_v35, %v250_v57 }
 0x1a3   :  { %v925_v51 = vpop.eup %924  ;;  %v472_v52 = vpop.f32.mrf.mxu1  ;;  %v255_v0 = vmul.f32 1.442695, %v252_v61 }
 0x1a4   :  { %v503_v53 = vmul.f32 0.25, %v472_v52  ;;  %v257_v54 = vsel %vm244_vm2, %v925_v51, 0.0  ;;  %v500_v56 = vpop.f32.mrf.mxu2 }
 0x1a5   :  { %258 = vadd.xlane.f32.xlu1 %v257_v54  ;;  %v504_v58 = vmul.f32 0.25, %v500_v56  ;;  %926 = vpow2.f32 %v255_v0 }
 0x1a6   :  { %v505_v55 = vsel %vm244_vm2, %v503_v53, -inf }
 0x1a7   :  { %506 = vmax.xlane.f32.xlu2 %v505_v55  ;;  %v508_v63 = vsel %vm244_vm2, %v504_v58, -inf }
 0x1ab   :  { %v604_v59 = vpop.f32.mrf.mxu1  ;;  %v927_v4 = vpop.eup %926 }
 0x1ac   :  { %v635_v60 = vmul.f32 0.25, %v604_v59  ;;  %v260_v5 = vsel %vm244_vm2, %v927_v4, 0.0 }
 0x1ae   :  { %v637_v62 = vsel %vm244_vm2, %v635_v60, -inf }
 0x1af   :  { %638 = vmax.xlane.f32.xlu1 %v637_v62  ;;  %509 = vmax.xlane.f32.xlu2 %v508_v63 }
 0x1b3   :  { %v632_v1 = vpop.f32.mrf.mxu2 }
 0x1b4   :  { %v636_v2 = vmul.f32 0.25, %v632_v1 }
 0x1b6   :  { %v640_v3 = vsel %vm244_vm2, %v636_v2, -inf }
 0x1b7   :  { %641 = vmax.xlane.f32.xlu0 %v640_v3 }
 0x1bf   :  { %261 = vadd.xlane.f32.xlu0 %v260_v5 }
 0x1d3   :  { %527 = vrot.lane.b32.xlu0 %v1228_v40, %s1069_s3 }
 0x20a   :  { %v373_v6 = vpop.xlane.xlu1 %372 }
 0x20b   :  { %v377_v7 = vsub.f32 %v369_v43, %v373_v6 }
 0x20d   :  { %v379_v8 = vmul.f32 1.442695, %v377_v7 }
 0x20f   :  { %928 = vpow2.f32 %v379_v8 }
 0x212   :  { %v376_v10 = vpop.xlane.xlu0 %375 }
 0x213   :  { %v378_v12 = vsub.f32 %v370_v49, %v376_v10 }
 0x215   :  { %v929_v13 = vpop.eup %928  ;;  %v381_v14 = vmul.f32 1.442695, %v378_v12 }
 0x216   :  { %v383_v15 = vsel %vm244_vm2, %v929_v13, 0.0 }
 0x217   :  { %930 = vpow2.f32 %v381_v14  ;;  %384 = vadd.xlane.f32.xlu2 %v383_v15 }
 0x218   :  { %v259_v16 = vpop.xlane.xlu1 %258 }
 0x219   :  { %932 = vrcp.f32 %v259_v16  ;;  %v749_v16 = vld [vmem:[%s1324_s6 + $0x38] sm:$0xff] }
 0x21a   :  { %v507_v17 = vpop.xlane.xlu2 %506  ;;  %769 = vmatpush.msra.mxu1 %v749_v16  ;;  %v923_v16 = vld [vmem:[%s1327_s9] ss:$0 sm:$0xff] }
 0x21b   :  { %v511_v25 = vsub.f32 %v503_v53, %v507_v17  ;;  %v748_v17 = vld [vmem:[%s1324_s6 + $0x30] sm:$0xff] }
 0x21c   :  { %770 = vmatpush.msra.mxu1 %v748_v17 }
 0x21d   :  { %v931_v18 = vpop.eup %930  ;;  %v513_v26 = vmul.f32 1.442695, %v511_v25 }
 0x21e   :  { %v386_v19 = vsel %vm244_vm2, %v931_v18, 0.0 }
 0x21f   :  { %v933_v20 = vpop.eup %932  ;;  %387 = vadd.xlane.f32.xlu0 %v386_v19  ;;  %v746_v19 = vld [vmem:[%s1324_s6 + $0x20] sm:$0xff] }
 0x220   :  { %v265_v21 = vmul.f32 %v933_v20, %v925_v51  ;;  %v745_v20 = vld [vmem:[%s1324_s6 + $0x18] sm:$0xff] }
 0x222   :  { %881 = vmatmul.msk.f32.vlgmr.msra.gmra.mxu3 %vm244_vm2, %v265_v21  ;;  %v510_v22 = vpop.xlane.xlu2 %509  ;;  %v639_v28 = vpop.xlane.xlu1 %638  ;;  %v744_v21 = vld [vmem:[%s1324_s6 + $0x10] sm:$0xff] }
 0x223   :  { %v512_v23 = vsub.f32 %v504_v58, %v510_v22  ;;  %v643_v31 = vsub.f32 %v635_v60, %v639_v28  ;;  %v743_v22 = vld [vmem:[%s1324_s6 + $0x8] sm:$0xff] }
 0x225   :  { %v515_v24 = vmul.f32 1.442695, %v512_v23  ;;  %v645_v33 = vmul.f32 1.442695, %v643_v31  ;;  %v742_v23 = vld [vmem:[%s1324_s6] sm:$0xff] }
 0x227   :  { %934 = vpow2.f32 %v515_v24 }
 0x228   :  { %936 = vpow2.f32 %v513_v26 }
 0x22a   :  { %v642_v27 = vpop.xlane.xlu0 %641 }
 0x22b   :  { %v644_v43 = vsub.f32 %v636_v2, %v642_v27 }
 0x22d   :  { %v935_v30 = vpop.eup %934  ;;  %v647_v44 = vmul.f32 1.442695, %v644_v43 }
 0x22e   :  { %v520_v32 = vsel %vm244_vm2, %v935_v30, 0.0  ;;  %v937_v35 = vpop.eup %936 }
 0x22f   :  { %917 = vrot.lane.b32.xlu2 %v916_v29, %s1070_s4  ;;  %521 = vadd.xlane.f32.xlu1 %v520_v32  ;;  %v517_v36 = vsel %vm244_vm2, %v937_v35, 0.0 }
 0x232   :  { %v262_v34 = vpop.xlane.xlu0 %261 }
 0x233   :  { %553 = vrot.lane.b32.xlu0 %v1231_v41, %s1069_s3  ;;  %938 = vrcp.f32 %v262_v34 }
 0x234   :  { %940 = vpow2.f32 %v645_v33 }
 0x235   :  { %942 = vpow2.f32 %v647_v44 }
 0x237   :  { %518 = vadd.xlane.f32.xlu1 %v517_v36  ;;  %v921_v36 = vld [vmem:[%s1325_s7] ss:$0 sm:$0xff] }
 0x239   :  { %v939_v37 = vpop.eup %938 }
 0x23a   :  { %v266_v38 = vmul.f32 %v939_v37, %v927_v4  ;;  %v941_v39 = vpop.eup %940 }
 0x23b   :  { %685 = vrot.lane.b32.xlu0 %v1231_v41, %s1071_s25  ;;  %v649_v42 = vsel %vm244_vm2, %v941_v39, 0.0  ;;  %v943_v45 = vpop.eup %942 }
 0x23c   :  { %882 = vmatmul.msk.f32.vlgmr.msrb.gmra.mxu0 %vm244_vm2, %v266_v38  ;;  %v652_v46 = vsel %vm244_vm2, %v943_v45, 0.0 }
 0x23f   :  { %650 = vadd.xlane.f32.xlu1 %v649_v42 }
 0x245   :  { %v528_v47 = vpop.permute.xlu0 %527 }
 0x258   :  { %653 = vadd.xlane.f32.xlu2 %v652_v46  ;;  %659 = vrot.lane.b32.xlu1 %v1228_v40, %s1071_s25 }
 0x28a   :  { %v385_v48 = vpop.xlane.xlu2 %384 }
 0x28b   :  { %944 = vrcp.f32 %v385_v48 }
 0x291   :  { %v945_v41 = vpop.eup %944 }
 0x292   :  { %v388_v49 = vpop.xlane.xlu0 %387  ;;  %v918_v50 = vpop.permute.xlu2 %917  ;;  %v391_v53 = vmul.f32 %v945_v41, %v929_v13 }
 0x293   :  { %946 = vrcp.f32 %v388_v49  ;;  %v920_v51 = vunpack.i.h.bf16 %v918_v50  ;;  %v919_v52 = vunpack.i.l.bf16 %v918_v50 }
 0x295   :  { %415 = vmatpush.msrb.mxu3 %v919_v52  ;;  %442 = vmatpush.msra.mxu0 %v920_v51 }
 0x296   :  { %887 = vmatmul.msk.f32.vlgmr.msrb.gmra.mxu3 %vm244_vm2, %v391_v53 }
 0x297   :  { %548 = vmatpush.msra.mxu3 %v528_v47  ;;  %v1075_v47 = vmov 32.0  }
 0x299   :  { %v947_v54 = vpop.eup %946 }
 0x29a   :  { %v392_v55 = vmul.f32 %v947_v54, %v931_v18  ;;  %v747_v18 = vld [vmem:[%s1324_s6 + $0x28] sm:$0xff] }
 0x29b   :  { %771 = vmatpush.msra.mxu1 %v747_v18 }
 0x29c   :  { %888 = vmatmul.msk.f32.vlgmr.msra.gmra.mxu0 %vm244_vm2, %v392_v55 }
 0x29d   :  { %772 = vmatpush.msra.mxu1 %v746_v19 }
 0x29f   :  { %773 = vmatpush.msra.mxu1 %v745_v20 }
 0x2a1   :  { %774 = vmatpush.msra.mxu1 %v744_v21 }
 0x2a2   :  { %v522_v40 = vpop.xlane.xlu1 %521 }
 0x2a3   :  { %948 = vrcp.f32 %v522_v40  ;;  %775 = vmatpush.msra.mxu1 %v743_v22 }
 0x2a5   :  { %v554_v56 = vpop.permute.xlu0 %553  ;;  %v287_v6 = vpop.f32.mrf.mxu3  ;;  %776 = vmatpush.msra.mxu1 %v742_v23 }
 0x2a6   :  { %574 = vmatpush.msrb.mxu0 %v554_v56 }
 0x2a9   :  { %v949_v57 = vpop.eup %948 }
 0x2aa   :  { %v526_v58 = vmul.f32 %v949_v57, %v935_v30  ;;  %v519_v59 = vpop.xlane.xlu1 %518 }
 0x2ab   :  { %950 = vrcp.f32 %v519_v59 }
 0x2ac   :  { %894 = vmatmul.msk.f32.vlgmr.msrb.gmra.mxu0 %vm244_vm2, %v526_v58 }
 0x2ad   :  { %v686_v60 = vpop.permute.xlu0 %685 }
 0x2ae   :  { %706 = vmatpush.msra.mxu0 %v686_v60 }
 0x2b1   :  { %v951_v61 = vpop.eup %950 }
 0x2b2   :  { %v525_v62 = vmul.f32 %v951_v61, %v937_v35  ;;  %v651_v63 = vpop.xlane.xlu1 %650 }
 0x2b3   :  { %952 = vrcp.f32 %v651_v63 }
 0x2b4   :  { %893 = vmatmul.msk.f32.vlgmr.msra.gmra.mxu3 %vm244_vm2, %v525_v62 }
 0x2b9   :  { %v953_v0 = vpop.eup %952  ;;  %v310_v8 = vpop.f32.mrf.mxu0 }
 0x2ba   :  { %v657_v1 = vmul.f32 %v953_v0, %v941_v39 }
 0x2ca   :  { %v660_v2 = vpop.permute.xlu1 %659 }
 0x2cb   :  { %v654_v3 = vpop.xlane.xlu2 %653  ;;  %680 = vmatpush.msrb.mxu3 %v660_v2 }
 0x2cc   :  { %954 = vrcp.f32 %v654_v3  ;;  %899 = vmatmul.msk.f32.vlgmr.msrb.gmra.mxu3 %vm244_vm2, %v657_v1 }
 0x2cd   :  { %956 = vrcp.f32 %v1075_v47 }
 0x2d2   :  { %v955_v4 = vpop.eup %954 }
 0x2d3   :  { %v658_v5 = vmul.f32 %v955_v4, %v943_v45  ;;  %v957_v48 = vpop.eup %956 }
 0x2d4   :  { %v793_v41 = vmul.f32 32.0, %v957_v48  ;;  %vm797_vm5 = vweird.f32 %v957_v48 }
 0x2d5   :  { %900 = vmatmul.msk.f32.vlgmr.msra.gmra.mxu0 %vm244_vm2, %v658_v5 }
 0x2d6   :  { %v794_v49 = vsub.f32 1.0, %v793_v41 }
 0x2d8   :  { %v795_v50 = vmul.f32 %v957_v48, %v794_v49 }
 0x2da   :  { %v796_v51 = vadd.f32 %v957_v48, %v795_v50 }
 0x2dc   :  { %v798_v52 = vsel %vm797_vm5, %v957_v48, %v796_v51 }
 0x319   :  { %v417_v7 = vpop.f32.mrf.mxu3  ;;  %v444_v12 = vpop.f32.mrf.mxu0 }
 0x31a   :  { %713 = vrot.lane.b32.xlu1 %v417_v7, %s1072_s5 }
 0x329   :  { %v576_v13 = vpop.f32.mrf.mxu0 }
 0x337   :  { %v550_v10 = vpop.f32.mrf.mxu3 }
 0x338   :  { %721 = vrot.lane.b32.xlu0 %v550_v10, %s1073_s11  ;;  %v922_v10 = vld [vmem:[%s1326_s8] ss:$0 sm:$0xff]  ;;  %s1076_s8 = smov [#allocation8]  }
 0x339   :  { %s855_s30 = sshll.u32 %s1076_s8, 4  ;;  %s856_s30 = int_to_ptr.vmem [resolvable:$true] %s855_s30 }
 0x340   :  { %715 = vrot.lane.b32.xlu0 %v444_v12, %s1072_s5 }
 0x34f   :  { %v682_v14 = vpop.f32.mrf.mxu3 }
 0x350   :  { %729 = vrot.lane.b32.xlu1 %v682_v14, %s1074_s12 }
 0x352   :  { %v708_v15 = vpop.f32.mrf.mxu0 }
 0x353   :  { %731 = vrot.lane.b32.xlu0 %v708_v15, %s1074_s12  ;;  %s857_s12 = sshll.u32 %s1328_s10, 4  ;;  %s858_s12 = int_to_ptr.hbm [resolvable:$true] %s857_s12 }
 0x358   :  { %723 = vrot.lane.b32.xlu1 %v576_v13, %s1073_s11 }
 0x38c   :  { %v714_v25 = vpop.permute.xlu1 %713 }
 0x38d   :  { %v735_v26 = vsel %vm189_vm1, %v287_v6, %v714_v25 }
 0x3aa   :  { %v722_v24 = vpop.permute.xlu0 %721 }
 0x3ab   :  { %v737_v27 = vsel %vm93_vm0, %v735_v26, %v722_v24 }
 0x3b2   :  { %v716_v29 = vpop.permute.xlu0 %715 }
 0x3b3   :  { %v736_v31 = vsel %vm189_vm1, %v310_v8, %v716_v29 }
 0x3c2   :  { %v730_v28 = vpop.permute.xlu1 %729 }
 0x3c3   :  { %v740_v30 = vsel %vm739_vm3, %v737_v27, %v730_v28 }
 0x3c4   :  { %901 = vmatmul.msk.f32.vlgmr.msra.gmra.mxu1 %vm754_vm4, %v740_v30 }
 0x3c5   :  { %v732_v33 = vpop.permute.xlu0 %731 }
 0x3ca   :  { %v724_v32 = vpop.permute.xlu1 %723 }
 0x3cb   :  { %v738_v34 = vsel %vm93_vm0, %v736_v31, %v724_v32 }
 0x3cc   :  { %v741_v35 = vsel %vm739_vm3, %v738_v34, %v732_v33 }
 0x3cd   :  { %902 = vmatmul.msk.f32.gmra.mxu1 %vm754_vm4, %v741_v35 }
 0x441   :  { %v778_v37 = vpop.f32.mrf.mxu1 }
 0x442   :  { %v779_v38 = vadd.f32 %v921_v36, %v778_v37 }
 0x444   :  { %v784_v39 = vadd.f32 %v779_v38, %v1174_v9 }
 0x446   :  { %v786_v42 = vsel %vm93_vm0, %v784_v39, 0.0 }
 0x447   :  { %787 = vadd.xlane.f32.xlu2 %v786_v42 }
 0x44a   :  { %v781_v43 = vpop.f32.mrf.mxu1 }
 0x44b   :  { %v782_v44 = vadd.f32 %v921_v36, %v781_v43 }
 0x44d   :  { %v785_v45 = vadd.f32 %v782_v44, %v1179_v11 }
 0x44f   :  { %v789_v46 = vsel %vm93_vm0, %v785_v45, 0.0 }
 0x450   :  { %790 = vadd.xlane.f32.xlu1 %v789_v46 }
 0x4ba   :  { %v788_v9 = vpop.xlane.xlu2 %787 }
 0x4bb   :  { %v799_v53 = vmul.f32 %v798_v52, %v788_v9 }
 0x4bd   :  { %v801_v54 = vsub.f32 %v784_v39, %v799_v53 }
 0x4bf   :  { %v803_v55 = vmul.f32 %v801_v54, %v801_v54 }
 0x4c1   :  { %v805_v40 = vsel %vm93_vm0, %v803_v55, 0.0 }
 0x4c2   :  { %806 = vadd.xlane.f32.xlu0 %v805_v40 }
 0x4c3   :  { %v791_v11 = vpop.xlane.xlu1 %790 }
 0x4c4   :  { %v800_v56 = vmul.f32 %v798_v52, %v791_v11 }
 0x4c6   :  { %v802_v57 = vsub.f32 %v785_v45, %v800_v56 }
 0x4c8   :  { %v804_v58 = vmul.f32 %v802_v57, %v802_v57 }
 0x4ca   :  { %v808_v59 = vsel %vm93_vm0, %v804_v58, 0.0 }
 0x4cb   :  { %809 = vadd.xlane.f32.xlu2 %v808_v59 }
 0x535   :  { %v807_v60 = vpop.xlane.xlu0 %806 }
 0x536   :  { %v811_v61 = vmul.f32 %v807_v60, %v798_v52 }
 0x538   :  { %v813_v62 = vadd.f32 1e-05, %v811_v61 }
 0x53a   :  { %958 = vrsqrt.f32 %v813_v62  ;;  %vm821_vm7 = vweird.f32 %v813_v62 }
 0x53e   :  { %v810_v63 = vpop.xlane.xlu2 %809 }
 0x53f   :  { %v812_v0 = vmul.f32 %v810_v63, %v798_v52 }
 0x540   :  { %v959_v1 = vpop.eup %958 }
 0x541   :  { %v816_v2 = vmul.f32 %v959_v1, %v813_v62  ;;  %v814_v3 = vadd.f32 1e-05, %v812_v0  ;;  %vm822_vm6 = vweird.f32 %v959_v1 }
 0x542   :  { %vm823_vm8 = vmor %vm821_vm7, %vm822_vm6 }
 0x543   :  { %v817_v4 = vmul.f32 %v959_v1, %v816_v2  ;;  %960 = vrsqrt.f32 %v814_v3  ;;  %vm831_vm10 = vweird.f32 %v814_v3 }
 0x545   :  { %v818_v5 = vmul.f32 0.5, %v817_v4 }
 0x547   :  { %v819_v6 = vsub.f32 1.5, %v818_v5 }
 0x549   :  { %v961_v7 = vpop.eup %960  ;;  %v820_v8 = vmul.f32 %v959_v1, %v819_v6 }
 0x54a   :  { %v826_v12 = vmul.f32 %v961_v7, %v814_v3  ;;  %vm832_vm9 = vweird.f32 %v961_v7 }
 0x54b   :  { %v824_v13 = vsel %vm823_vm8, %v959_v1, %v820_v8  ;;  %vm833_vm11 = vmor %vm831_vm10, %vm832_vm9 }
 0x54c   :  { %v835_v14 = vmul.f32 %v824_v13, %v801_v54  ;;  %v827_v15 = vmul.f32 %v961_v7, %v826_v12 }
 0x54e   :  { %v841_v17 = vmul.f32 %v922_v10, %v835_v14  ;;  %v828_v18 = vmul.f32 0.5, %v827_v15 }
 0x550   :  { %v829_v19 = vsub.f32 1.5, %v828_v18  ;;  %v847_v20 = vadd.f32 %v923_v16, %v841_v17 }
 0x552   :  { %v830_v21 = vmul.f32 %v961_v7, %v829_v19  ;;  %849 = vst.msk [vmem:[#allocation8] sm:$0xff] %vm93_vm0, %v847_v20 }
 0x554   :  { %v834_v22 = vsel %vm833_vm11, %v961_v7, %v830_v21 }
 0x555   :  { %v836_v23 = vmul.f32 %v834_v22, %v802_v57 }
 0x557   :  { %v842_v24 = vmul.f32 %v922_v10, %v836_v23 }
 0x559   :  { %v848_v25 = vadd.f32 %v923_v16, %v842_v24 }
 0x55b   :  { %850 = vst.msk [vmem:[#allocation8 + $0x8] sm:$0xff] %vm93_vm0, %v848_v25 }
 0x55c   :  { %863 = dma.vmem_to_hbm [thread:$0]  %s856_s30, 256, %s858_s12, [#allocation4], %s1065_s21, %s1065_s21, %s1066_s22  }
 0x55d   :  { %1062 = dma.done.wait [#allocation4], 256  }
 0x55e   :  { %1063 = vsyncadd [#allocation4], 4294967040 }
 0x55f   :  { %868 = vsyncpa [#allocation3], 1 }
 0x560   :  { %869 = vsyncpa [#allocation6], 1 }
 0x561   :  { %870 = vsyncpa [#allocation4], 1 }

</bundles_post_ra>
